<compile_context>
chip_gen: v5e
topology: v5e:2x2
jax: 0.10.0
libtpu: 0.0.40
codegen_flags: <defaults>
</compile_context>

<pallas_src>
import math

import numpy as np
import jax
import jax.numpy as jnp
from jax.experimental import pallas as pl
from jax.experimental.pallas import tpu as pltpu


def _round_up(x, m):
    return ((x + m - 1) // m) * m


def _conv_out(n, k, s):
    return (n - k) // s + 1


def _choose_tiles(batch_size):
    """Batch tile (sublane rows per grid step) and padded batch."""
    b8 = _round_up(max(batch_size, 1), 8)
    if b8 <= 16:                       # too small to split usefully
        return b8, b8
    if b8 <= 512:                      # 2 steps -> both v7x TensorCores get work
        tb = _round_up((b8 + 1) // 2, 8)
        return tb, _round_up(b8, tb)
    tb = 256                           # large batch: amortize per-step overhead
    return tb, _round_up(batch_size, tb)


# ----------------------------------------------------------------------------
# Fused forward builder
# ----------------------------------------------------------------------------
def make_critic_forward(state_size, action_size, hidden_layers, batch_size):
    H, W = state_size
    A = action_size
    H0, H1 = hidden_layers[0], hidden_layers[1]
    OH1, OW1 = _conv_out(H, 4, 2), _conv_out(W, 4, 2)
    OH2, OW2 = _conv_out(OH1, 3, 2), _conv_out(OW1, 3, 2)
    S_FLAT = H * W
    F1 = 4 * OH1 * OW1          # conv1 output features (196 for 16x16)
    F2 = 16 * OH2 * OW2         # conv2 output features (144 for 16x16)

    TB, B_pad = _choose_tiles(batch_size)
    grid = (B_pad // TB,)

    def kernel(st_ref, ac_ref,
               w1_ref, b1_ref,          # conv1 Toeplitz   (S_FLAT, F1), (1, F1)
               w2_ref, b2_ref,          # conv2 Toeplitz   (F1, F2),     (1, F2)
               wa_ref, ba_ref,          # conv_action      (A, H0),      (1, H0)
               w1s_ref, w1a_ref, bf1_ref,  # fc1 split     (F2,H1),(H0,H1),(1,H1)
               wf2_ref, bf2_ref,        # fc2              (1, H1),      (1, 1)
               o_ref):
        f32 = jnp.float32

        # conv1 + ReLU  (one MXU matmul, zeros baked into the Toeplitz weight)
        h1 = jnp.dot(st_ref[...], w1_ref[...], preferred_element_type=f32)
        h1 = jnp.maximum(h1 + b1_ref[...], 0.0)                       # (TB, F1)

        # conv2 + ReLU  (one MXU matmul)
        xs = jnp.dot(h1, w2_ref[...], preferred_element_type=f32)
        xs = jnp.maximum(xs + b2_ref[...], 0.0)                       # (TB, F2)

        # conv_action: Linear(A -> H0) + ReLU
        xa = jnp.dot(ac_ref[...], wa_ref[...], preferred_element_type=f32)
        xa = jnp.maximum(xa + ba_ref[...], 0.0)                       # (TB, H0)

        # fc1 on concat([xs, xa]) done concat-free as two matmuls + bias, + ReLU
        h = (jnp.dot(xs, w1s_ref[...], preferred_element_type=f32)
             + jnp.dot(xa, w1a_ref[...], preferred_element_type=f32)
             + bf1_ref[...])
        h = jnp.maximum(h, 0.0)                                       # (TB, H1)

        # fc2 (H1 -> 1): VPU multiply + lane reduction (avoid an N=1 matmul)
        o_ref[...] = jnp.sum(h * wf2_ref[...], axis=1, keepdims=True) + bf2_ref[...]

    vmem = pl.BlockSpec(memory_space=pltpu.MemorySpace.VMEM)
    call = pl.pallas_call(
        kernel,
        out_shape=jax.ShapeDtypeStruct((B_pad, 1), jnp.float32),
        grid=grid,
        in_specs=[
            pl.BlockSpec((TB, S_FLAT), lambda i: (i, 0)),   # state  (rows = batch)
            pl.BlockSpec((TB, A), lambda i: (i, 0)),        # action
            vmem, vmem,                                     # W1, b1
            vmem, vmem,                                     # W2, b2
            vmem, vmem,                                     # Wa, ba
            vmem, vmem, vmem,                               # W1s, W1a, bf1
            vmem, vmem,                                     # wf2, bf2
        ],
        out_specs=pl.BlockSpec((TB, 1), lambda i: (i, 0)),
        compiler_params=pltpu.CompilerParams(
            dimension_semantics=("parallel",)),
    )

    def forward(packed_params, state, action):
        B = state.shape[0]
        assert B <= B_pad, "forward built for a smaller batch"
        st = state.reshape(B, S_FLAT)                   # free reshape, no transpose
        if B_pad != B:
            st = jnp.pad(st, ((0, B_pad - B), (0, 0)))
            action = jnp.pad(action, ((0, B_pad - B), (0, 0)))
        out = call(st, action, *packed_params)          # (B_pad, 1)
        return out[:B]                                  # (B, 1)

    return forward


# ----------------------------------------------------------------------------
# Deterministic torch-style params
# ----------------------------------------------------------------------------
def init_params(key, state_size, action_size, hidden_layers):
    H, W = state_size
    OH1, OW1 = _conv_out(H, 4, 2), _conv_out(W, 4, 2)
    OH2, OW2 = _conv_out(OH1, 3, 2), _conv_out(OW1, 3, 2)
    conv_flat = 16 * OH2 * OW2
    combined = conv_flat + hidden_layers[0]
    ks = jax.random.split(key, 10)

    def u(k, shape, fan_in):
        b = 1.0 / math.sqrt(fan_in)
        return jax.random.uniform(k, shape, jnp.float32, -b, b)

    return dict(
        conv1_w=u(ks[0], (4, 1, 4, 4), 16), conv1_b=u(ks[1], (4,), 16),
        conv2_w=u(ks[2], (16, 4, 3, 3), 36), conv2_b=u(ks[3], (16,), 36),
        act_w=u(ks[4], (hidden_layers[0], action_size), action_size),
        act_b=u(ks[5], (hidden_layers[0],), action_size),
        fc1_w=u(ks[6], (hidden_layers[1], combined), combined),
        fc1_b=u(ks[7], (hidden_layers[1],), combined),
        fc2_w=u(ks[8], (1, hidden_layers[-1]), hidden_layers[-1]),
        fc2_b=u(ks[9], (1,), hidden_layers[-1]),
    )


# ----------------------------------------------------------------------------
# One-time packing: convs -> Toeplitz matrices, fc1 split into state/action parts
# ----------------------------------------------------------------------------
def pack_params(p, state_size, action_size, hidden_layers):
    H, W = state_size
    OH1, OW1 = _conv_out(H, 4, 2), _conv_out(W, 4, 2)
    OH2, OW2 = _conv_out(OH1, 3, 2), _conv_out(OW1, 3, 2)
    F1 = 4 * OH1 * OW1
    F2 = 16 * OH2 * OW2
    H0, H1 = hidden_layers[0], hidden_layers[1]

    c1w = np.asarray(p["conv1_w"], np.float32)
    c1b = np.asarray(p["conv1_b"], np.float32)
    c2w = np.asarray(p["conv2_w"], np.float32)
    c2b = np.asarray(p["conv2_b"], np.float32)

    # conv1 Toeplitz: h1[:, j] with j = (oh1*OW1 + ow1)*4 + oc (internal ordering)
    W1 = np.zeros((H * W, F1), np.float32)
    b1 = np.zeros((1, F1), np.float32)
    for oc in range(4):
        for oh1 in range(OH1):
            for ow1 in range(OW1):
                j = (oh1 * OW1 + ow1) * 4 + oc
                b1[0, j] = c1b[oc]
                for kh in range(4):
                    for kw in range(4):
                        W1[(2 * oh1 + kh) * W + (2 * ow1 + kw), j] = c1w[oc, 0, kh, kw]

    # conv2 Toeplitz: xs[:, m] with m = c*OH2*OW2 + oh*OW2 + ow  (torch Flatten order,
    # so fc1's state-half needs no permutation).
    W2 = np.zeros((F1, F2), np.float32)
    b2 = np.zeros((1, F2), np.float32)
    for c in range(16):
        for oh in range(OH2):
            for ow in range(OW2):
                m = (c * OH2 + oh) * OW2 + ow
                b2[0, m] = c2b[c]
                for ic in range(4):
                    for kh in range(3):
                        for kw in range(3):
                            j = ((2 * oh + kh) * OW1 + (2 * ow + kw)) * 4 + ic
                            W2[j, m] = c2w[c, ic, kh, kw]

    wa = np.asarray(p["act_w"], np.float32).T                    # (A, H0)
    ba = np.asarray(p["act_b"], np.float32).reshape(1, H0)
    fc1 = np.asarray(p["fc1_w"], np.float32)                     # (H1, F2 + H0)
    w1s = np.ascontiguousarray(fc1[:, :F2].T)                    # (F2, H1)
    w1a = np.ascontiguousarray(fc1[:, F2:].T)                    # (H0, H1)
    bf1 = np.asarray(p["fc1_b"], np.float32).reshape(1, H1)
    wf2 = np.asarray(p["fc2_w"], np.float32).reshape(1, H1)
    bf2 = np.asarray(p["fc2_b"], np.float32).reshape(1, 1)

    return tuple(jnp.asarray(x) for x in
                 (W1, b1, W2, b2, wa, ba, w1s, w1a, bf1, wf2, bf2))


# ----------------------------------------------------------------------------
# Pure-JAX reference (mirrors CriticNetwork.forward) for a correctness check
# ----------------------------------------------------------------------------
def reference_forward(p, state, action):
    x = jax.lax.conv_general_dilated(
        state, p["conv1_w"], (2, 2), "VALID",
        dimension_numbers=("NCHW", "OIHW", "NCHW"))
    x = jax.nn.relu(x + p["conv1_b"][None, :, None, None])
    x = jax.lax.conv_general_dilated(
        x, p["conv2_w"], (2, 2), "VALID",
        dimension_numbers=("NCHW", "OIHW", "NCHW"))
    x = jax.nn.relu(x + p["conv2_b"][None, :, None, None])
    xs = x.reshape(x.shape[0], -1)                    # torch Flatten (C,H,W)
    xa = jax.nn.relu(action @ p["act_w"].T + p["act_b"])
    xc = jnp.concatenate([xs, xa], axis=1)
    h = jax.nn.relu(xc @ p["fc1_w"].T + p["fc1_b"])
    return h @ p["fc2_w"].T + p["fc2_b"]


# ----------------------------------------------------------------------------
if __name__ == "__main__":
    state_size = (16, 16)
    action_size = 4
    hidden_layers = (32, 32)
    B = 2

    key = jax.random.PRNGKey(0)
    k_state, k_action, k_params = jax.random.split(key, 3)
    state = jax.random.normal(k_state, (B, 1) + state_size, jnp.float32)
    action = jax.random.normal(k_action, (B, action_size), jnp.float32)

    params = init_params(k_params, state_size, action_size, hidden_layers)
    packed = pack_params(params, state_size, action_size, hidden_layers)

    forward = make_critic_forward(state_size, action_size, hidden_layers, B)
    fwd = jax.jit(lambda s, a: forward(packed, s, a))

    out = jax.block_until_ready(fwd(state, action))
    assert out.shape == (B, 1) and out.dtype == jnp.float32

    ref = jax.block_until_ready(reference_forward(params, state, action))
    max_err = float(jnp.max(jnp.abs(out - ref)))
    assert max_err < 1e-3, f"mismatch vs reference: {max_err}"

    print("KERNEL_OK")
</pallas_src>

<mosaic_0001>
module attributes {stable_mosaic.version = 11 : i64} {
  func.func @kernel(%arg0: i32, %arg1: memref<8x256xf32, #tpu.memory_space<vmem>>, %arg2: memref<8x4xf32, #tpu.memory_space<vmem>>, %arg3: memref<256x196xf32, #tpu.memory_space<vmem>>, %arg4: memref<1x196xf32, #tpu.memory_space<vmem>>, %arg5: memref<196x144xf32, #tpu.memory_space<vmem>>, %arg6: memref<1x144xf32, #tpu.memory_space<vmem>>, %arg7: memref<4x32xf32, #tpu.memory_space<vmem>>, %arg8: memref<1x32xf32, #tpu.memory_space<vmem>>, %arg9: memref<144x32xf32, #tpu.memory_space<vmem>>, %arg10: memref<32x32xf32, #tpu.memory_space<vmem>>, %arg11: memref<1x32xf32, #tpu.memory_space<vmem>>, %arg12: memref<1x32xf32, #tpu.memory_space<vmem>>, %arg13: memref<1x1xf32, #tpu.memory_space<vmem>>, %arg14: memref<8x1xf32, #tpu.memory_space<vmem>>) attributes {dimension_semantics = [#tpu.dimension_semantics<parallel>], iteration_bounds = array<i64: 1>, scalar_prefetch = 0 : i64, scratch_operands = 0 : i64, tpu.core_type = #tpu.core_type<tc>, window_params = [{transform_indices = @transform_0, window_bounds = array<i64: 8, 256>}, {transform_indices = @transform_1, window_bounds = array<i64: 8, 4>}, {pipeline_mode = #tpu.pipeline_mode<synchronous>, transform_indices = @transform_2, window_bounds = array<i64: 256, 196>}, {pipeline_mode = #tpu.pipeline_mode<synchronous>, transform_indices = @transform_3, window_bounds = array<i64: 1, 196>}, {pipeline_mode = #tpu.pipeline_mode<synchronous>, transform_indices = @transform_4, window_bounds = array<i64: 196, 144>}, {pipeline_mode = #tpu.pipeline_mode<synchronous>, transform_indices = @transform_5, window_bounds = array<i64: 1, 144>}, {pipeline_mode = #tpu.pipeline_mode<synchronous>, transform_indices = @transform_6, window_bounds = array<i64: 4, 32>}, {pipeline_mode = #tpu.pipeline_mode<synchronous>, transform_indices = @transform_7, window_bounds = array<i64: 1, 32>}, {pipeline_mode = #tpu.pipeline_mode<synchronous>, transform_indices = @transform_8, window_bounds = array<i64: 144, 32>}, {pipeline_mode = #tpu.pipeline_mode<synchronous>, transform_indices = @transform_9, window_bounds = array<i64: 32, 32>}, {pipeline_mode = #tpu.pipeline_mode<synchronous>, transform_indices = @transform_10, window_bounds = array<i64: 1, 32>}, {pipeline_mode = #tpu.pipeline_mode<synchronous>, transform_indices = @transform_11, window_bounds = array<i64: 1, 32>}, {pipeline_mode = #tpu.pipeline_mode<synchronous>, transform_indices = @transform_12, window_bounds = array<i64: 1, 1>}, {transform_indices = @transform_13, window_bounds = array<i64: 8, 1>}]} {
    %c0 = arith.constant 0 : index
    %c0_0 = arith.constant 0 : index
    %0 = vector.load %arg1[%c0, %c0_0] : memref<8x256xf32, #tpu.memory_space<vmem>>, vector<8x256xf32>
    %c0_1 = arith.constant 0 : index
    %c0_2 = arith.constant 0 : index
    %1 = vector.load %arg3[%c0_1, %c0_2] : memref<256x196xf32, #tpu.memory_space<vmem>>, vector<256x196xf32>
    %cst = arith.constant dense<0.000000e+00> : vector<8x196xf32>
    %2 = tpu.matmul %0, %1, %cst {dimension_numbers = #tpu.dot_dimension_numbers<[1], [0], [0], [1], [0, 0, 1, 1], [], []>} : vector<8x256xf32>, vector<256x196xf32>, vector<8x196xf32> -> vector<8x196xf32>
    %c0_3 = arith.constant 0 : index
    %c0_4 = arith.constant 0 : index
    %3 = vector.load %arg4[%c0_3, %c0_4] : memref<1x196xf32, #tpu.memory_space<vmem>>, vector<1x196xf32>
    %4 = vector.broadcast %3 : vector<1x196xf32> to vector<8x196xf32>
    %5 = arith.addf %2, %4 : vector<8x196xf32>
    %cst_5 = arith.constant 0.000000e+00 : f32
    %6 = vector.broadcast %cst_5 : f32 to vector<8x196xf32>
    %7 = arith.maximumf %5, %6 : vector<8x196xf32>
    %c0_6 = arith.constant 0 : index
    %c0_7 = arith.constant 0 : index
    %8 = vector.load %arg5[%c0_6, %c0_7] : memref<196x144xf32, #tpu.memory_space<vmem>>, vector<196x144xf32>
    %cst_8 = arith.constant dense<0.000000e+00> : vector<8x144xf32>
    %9 = tpu.matmul %7, %8, %cst_8 {dimension_numbers = #tpu.dot_dimension_numbers<[1], [0], [0], [1], [0, 0, 1, 1], [], []>} : vector<8x196xf32>, vector<196x144xf32>, vector<8x144xf32> -> vector<8x144xf32>
    %c0_9 = arith.constant 0 : index
    %c0_10 = arith.constant 0 : index
    %10 = vector.load %arg6[%c0_9, %c0_10] : memref<1x144xf32, #tpu.memory_space<vmem>>, vector<1x144xf32>
    %11 = vector.broadcast %10 : vector<1x144xf32> to vector<8x144xf32>
    %12 = arith.addf %9, %11 : vector<8x144xf32>
    %cst_11 = arith.constant 0.000000e+00 : f32
    %13 = vector.broadcast %cst_11 : f32 to vector<8x144xf32>
    %14 = arith.maximumf %12, %13 : vector<8x144xf32>
    %c0_12 = arith.constant 0 : index
    %c0_13 = arith.constant 0 : index
    %15 = vector.load %arg2[%c0_12, %c0_13] : memref<8x4xf32, #tpu.memory_space<vmem>>, vector<8x4xf32>
    %c0_14 = arith.constant 0 : index
    %c0_15 = arith.constant 0 : index
    %16 = vector.load %arg7[%c0_14, %c0_15] : memref<4x32xf32, #tpu.memory_space<vmem>>, vector<4x32xf32>
    %cst_16 = arith.constant dense<0.000000e+00> : vector<8x32xf32>
    %17 = tpu.matmul %15, %16, %cst_16 {dimension_numbers = #tpu.dot_dimension_numbers<[1], [0], [0], [1], [0, 0, 1, 1], [], []>} : vector<8x4xf32>, vector<4x32xf32>, vector<8x32xf32> -> vector<8x32xf32>
    %c0_17 = arith.constant 0 : index
    %c0_18 = arith.constant 0 : index
    %18 = vector.load %arg8[%c0_17, %c0_18] : memref<1x32xf32, #tpu.memory_space<vmem>>, vector<1x32xf32>
    %19 = vector.broadcast %18 : vector<1x32xf32> to vector<8x32xf32>
    %20 = arith.addf %17, %19 : vector<8x32xf32>
    %cst_19 = arith.constant 0.000000e+00 : f32
    %21 = vector.broadcast %cst_19 : f32 to vector<8x32xf32>
    %22 = arith.maximumf %20, %21 : vector<8x32xf32>
    %c0_20 = arith.constant 0 : index
    %c0_21 = arith.constant 0 : index
    %23 = vector.load %arg9[%c0_20, %c0_21] : memref<144x32xf32, #tpu.memory_space<vmem>>, vector<144x32xf32>
    %cst_22 = arith.constant dense<0.000000e+00> : vector<8x32xf32>
    %24 = tpu.matmul %14, %23, %cst_22 {dimension_numbers = #tpu.dot_dimension_numbers<[1], [0], [0], [1], [0, 0, 1, 1], [], []>} : vector<8x144xf32>, vector<144x32xf32>, vector<8x32xf32> -> vector<8x32xf32>
    %c0_23 = arith.constant 0 : index
    %c0_24 = arith.constant 0 : index
    %25 = vector.load %arg10[%c0_23, %c0_24] : memref<32x32xf32, #tpu.memory_space<vmem>>, vector<32x32xf32>
    %cst_25 = arith.constant dense<0.000000e+00> : vector<8x32xf32>
    %26 = tpu.matmul %22, %25, %cst_25 {dimension_numbers = #tpu.dot_dimension_numbers<[1], [0], [0], [1], [0, 0, 1, 1], [], []>} : vector<8x32xf32>, vector<32x32xf32>, vector<8x32xf32> -> vector<8x32xf32>
    %27 = arith.addf %24, %26 : vector<8x32xf32>
    %c0_26 = arith.constant 0 : index
    %c0_27 = arith.constant 0 : index
    %28 = vector.load %arg11[%c0_26, %c0_27] : memref<1x32xf32, #tpu.memory_space<vmem>>, vector<1x32xf32>
    %29 = vector.broadcast %28 : vector<1x32xf32> to vector<8x32xf32>
    %30 = arith.addf %27, %29 : vector<8x32xf32>
    %cst_28 = arith.constant 0.000000e+00 : f32
    %31 = vector.broadcast %cst_28 : f32 to vector<8x32xf32>
    %32 = arith.maximumf %30, %31 : vector<8x32xf32>
    %c0_29 = arith.constant 0 : index
    %c0_30 = arith.constant 0 : index
    %33 = vector.load %arg12[%c0_29, %c0_30] : memref<1x32xf32, #tpu.memory_space<vmem>>, vector<1x32xf32>
    %34 = vector.broadcast %33 : vector<1x32xf32> to vector<8x32xf32>
    %35 = arith.mulf %32, %34 : vector<8x32xf32>
    %cst_31 = arith.constant dense<0.000000e+00> : vector<8xf32>
    %36 = vector.multi_reduction <add>, %35, %cst_31 [1] : vector<8x32xf32> to vector<8xf32>
    %37 = vector.shape_cast %36 : vector<8xf32> to vector<8x1xf32>
    %c0_32 = arith.constant 0 : index
    %c0_33 = arith.constant 0 : index
    %38 = vector.load %arg13[%c0_32, %c0_33] : memref<1x1xf32, #tpu.memory_space<vmem>>, vector<1x1xf32>
    %39 = vector.broadcast %38 : vector<1x1xf32> to vector<8x1xf32>
    %40 = arith.addf %37, %39 : vector<8x1xf32>
    %c0_34 = arith.constant 0 : index
    %c0_35 = arith.constant 0 : index
    %41 = vector.load %arg14[%c0_34, %c0_35] : memref<8x1xf32, #tpu.memory_space<vmem>>, vector<8x1xf32>
    tpu.vector_store %arg14[%c0_34, %c0_35], %40 {strides = array<i32>} : memref<8x1xf32, #tpu.memory_space<vmem>>, vector<8x1xf32>,
    return
  }
  func.func @transform_0(%arg0: i32) -> (i32, i32) {
    %c0_i32 = arith.constant 0 : i32
    %c0_i32_0 = arith.constant 0 : i32
    return %arg0, %c0_i32 : i32, i32
  }
  func.func @transform_1(%arg0: i32) -> (i32, i32) {
    %c0_i32 = arith.constant 0 : i32
    %c0_i32_0 = arith.constant 0 : i32
    return %arg0, %c0_i32 : i32, i32
  }
  func.func @transform_2(%arg0: i32) -> (i32, i32) {
    %c0_i32 = arith.constant 0 : i32
    %c0_i32_0 = arith.constant 0 : i32
    %c0_i32_1 = arith.constant 0 : i32
    return %c0_i32, %c0_i32_0 : i32, i32
  }
  func.func @transform_3(%arg0: i32) -> (i32, i32) {
    %c0_i32 = arith.constant 0 : i32
    %c0_i32_0 = arith.constant 0 : i32
    %c0_i32_1 = arith.constant 0 : i32
    return %c0_i32, %c0_i32_0 : i32, i32
  }
  func.func @transform_4(%arg0: i32) -> (i32, i32) {
    %c0_i32 = arith.constant 0 : i32
    %c0_i32_0 = arith.constant 0 : i32
    %c0_i32_1 = arith.constant 0 : i32
    return %c0_i32, %c0_i32_0 : i32, i32
  }
  func.func @transform_5(%arg0: i32) -> (i32, i32) {
    %c0_i32 = arith.constant 0 : i32
    %c0_i32_0 = arith.constant 0 : i32
    %c0_i32_1 = arith.constant 0 : i32
    return %c0_i32, %c0_i32_0 : i32, i32
  }
  func.func @transform_6(%arg0: i32) -> (i32, i32) {
    %c0_i32 = arith.constant 0 : i32
    %c0_i32_0 = arith.constant 0 : i32
    %c0_i32_1 = arith.constant 0 : i32
    return %c0_i32, %c0_i32_0 : i32, i32
  }
  func.func @transform_7(%arg0: i32) -> (i32, i32) {
    %c0_i32 = arith.constant 0 : i32
    %c0_i32_0 = arith.constant 0 : i32
    %c0_i32_1 = arith.constant 0 : i32
    return %c0_i32, %c0_i32_0 : i32, i32
  }
  func.func @transform_8(%arg0: i32) -> (i32, i32) {
    %c0_i32 = arith.constant 0 : i32
    %c0_i32_0 = arith.constant 0 : i32
    %c0_i32_1 = arith.constant 0 : i32
    return %c0_i32, %c0_i32_0 : i32, i32
  }
  func.func @transform_9(%arg0: i32) -> (i32, i32) {
    %c0_i32 = arith.constant 0 : i32
    %c0_i32_0 = arith.constant 0 : i32
    %c0_i32_1 = arith.constant 0 : i32
    return %c0_i32, %c0_i32_0 : i32, i32
  }
  func.func @transform_10(%arg0: i32) -> (i32, i32) {
    %c0_i32 = arith.constant 0 : i32
    %c0_i32_0 = arith.constant 0 : i32
    %c0_i32_1 = arith.constant 0 : i32
    return %c0_i32, %c0_i32_0 : i32, i32
  }
  func.func @transform_11(%arg0: i32) -> (i32, i32) {
    %c0_i32 = arith.constant 0 : i32
    %c0_i32_0 = arith.constant 0 : i32
    %c0_i32_1 = arith.constant 0 : i32
    return %c0_i32, %c0_i32_0 : i32, i32
  }
  func.func @transform_12(%arg0: i32) -> (i32, i32) {
    %c0_i32 = arith.constant 0 : i32
    %c0_i32_0 = arith.constant 0 : i32
    %c0_i32_1 = arith.constant 0 : i32
    return %c0_i32, %c0_i32_0 : i32, i32
  }
  func.func @transform_13(%arg0: i32) -> (i32, i32) {
    %c0_i32 = arith.constant 0 : i32
    %c0_i32_0 = arith.constant 0 : i32
    return %arg0, %c0_i32 : i32, i32
  }
}

</mosaic_0001>

<bundles_post_ra>
// kernel: _lambda_.1
= control target key start
LH: loop header
LB: loop body
LE: loop exit
PB: predicated region body
PF: predicated region fallthrough
CT: control target
= control target key end

     0   :  { %s778_s0 = inlined_call_operand.vmem [shape: f32[8,256], index: 0, kind: input, shape index: {}]   ;;  %s779_s1 = inlined_call_operand.vmem [shape: f32[8,4], index: 1, kind: input, shape index: {}]   ;;  %s780_s2 = inlined_call_operand.hbm [shape: f32[256,196], index: 2, kind: input, shape index: {}]   ;;  %s781_s3 = inlined_call_operand.vmem [shape: f32[1,196], index: 3, kind: input, shape index: {}]   ;;  %s782_s4 = inlined_call_operand.hbm [shape: f32[196,144], index: 4, kind: input, shape index: {}]   ;;  %s783_s5 = inlined_call_operand.vmem [shape: f32[1,144], index: 5, kind: input, shape index: {}]   ;;  %s784_s6 = inlined_call_operand.vmem [shape: f32[4,32], index: 6, kind: input, shape index: {}]   ;;  %s785_s7 = inlined_call_operand.vmem [shape: f32[1,32], index: 7, kind: input, shape index: {}]   ;;  %s786_s8 = inlined_call_operand.hbm [shape: f32[144,32], index: 8, kind: input, shape index: {}]   ;;  %s787_s9 = inlined_call_operand.vmem [shape: f32[32,32], index: 9, kind: input, shape index: {}]   ;;  %s788_s10 = inlined_call_operand.vmem [shape: f32[1,32], index: 10, kind: input, shape index: {}]   ;;  %s789_s11 = inlined_call_operand.vmem [shape: f32[1,32], index: 11, kind: input, shape index: {}]   ;;  %s790_s12 = inlined_call_operand.<no memory space> [shape: f32[1,1], index: 12, kind: input, shape index: {}]   ;;  %s791_s13 = inlined_call_operand.vmem [shape: f32[8,1], index: 13, kind: output, shape index: {}]  }
   0x1   :  { %v18_v0 = vstv %s790_s12 }
   0x2   :  { %19 = vst [vmem:[#allocation2] sm:$0x1] %v18_v0 }
   0x3   :  { %20 = vsyncpa [#allocation4], 0 }
   0x4   :  { %21 = vsyncpa [#allocation6], 0  ;;  %s45_s29 = sshll.u32 %s782_s4, 4  ;;  %s642_s30 = smov [#allocation5]   ;;  %s46_s29 = int_to_ptr.hbm [resolvable:$true] %s45_s29 }
   0x5   :  { %s47_s14 = sshll.u32 %s642_s30, 4  ;;  %s30_s17 = sshll.u32 %s780_s2, 4  ;;  %s48_s14 = int_to_ptr.vmem [resolvable:$true] %s47_s14  ;;  %s31_s17 = int_to_ptr.hbm [resolvable:$true] %s30_s17 }
   0x6   :  { %s643_s18 = smov 256   ;;  %s644_s19 = smov 16  }
   0x7   :  { %53 = dma.hbm_to_vmem [thread:$0]  %s46_s29, 6400, %s48_s14, [#allocation6], %s643_s18, %s643_s18, %s644_s19  }
   0x8   :  { %s645_s12 = smov [#allocation3]   ;;  %s64_s23 = sshll.u32 %s786_s8, 4  ;;  %s65_s23 = int_to_ptr.hbm [resolvable:$true] %s64_s23 }
   0x9   :  { %s32_s20 = sshll.u32 %s645_s12, 4  ;;  %s646_s4 = smov [#allocation7]   ;;  %s33_s20 = int_to_ptr.vmem [resolvable:$true] %s32_s20 }
   0xa   :  { %38 = dma.hbm_to_vmem [thread:$0]  %s31_s17, 8192, %s33_s20, [#allocation4], %s643_s18, %s643_s18, %s644_s19  }
   0xb   :  { %s66_s24 = sshll.u32 %s646_s4, 4  ;;  %s647_s25 = smov 128   ;;  %s67_s24 = int_to_ptr.vmem [resolvable:$true] %s66_s24 }
   0xc   :  { %s648_s26 = smov 8  }
   0xd   :  { %72 = dma.hbm_to_vmem [thread:$0]  %s65_s23, 2304, %s67_s24, [#allocation6], %s647_s25, %s647_s25, %s648_s26  }
   0xe   :  { %638 = dma.done.wait [#allocation4], 8192  }
   0xf   :  { %639 = vsyncadd [#allocation4], 4294959104 }
  0x10   :  { %640 = dma.done.wait [#allocation6], 8704  }
  0x11   :  { %641 = vsyncadd [#allocation6], 4294958592  ;;  %v125_v1 = vld [vmem:[#allocation3 + $0xf0] sm:$0xff]  ;;  %v126_v2 = vld [vmem:[#allocation3 + $0xf8] sm:$0xff]  ;;  %vm307_vm0 = vcmask 1043456   ;;  %vm402_vm1 = vcmask 31744  }
  0x12   :  { %v123_v3 = vld [vmem:[#allocation3 + $0xe0] sm:$0xff]  ;;  %165 = vmatpush.msra.mxu0 %v125_v1  ;;  %205 = vmatpush.msra.mxu2 %v126_v2  ;;  %v157_v4 = vld [vmem:[#allocation3 + $0x1f0] sm:$0xff]  ;;  %v124_v5 = vld [vmem:[#allocation3 + $0xe8] sm:$0xff]  ;;  %vm303_vm2 = vcmask 556032   ;;  %vm452_vm3 = vcmask 261120   ;;  %vm476_vm4 = vcmask 130048  }
  0x13   :  { %v158_v6 = vld [vmem:[#allocation3 + $0x1f8] sm:$0xff]  ;;  %185 = vmatpush.msra.mxu1 %v157_v4  ;;  %v121_v7 = vld [vmem:[#allocation3 + $0xd0] sm:$0xff]  ;;  %v155_v8 = vld [vmem:[#allocation3 + $0x1e0] sm:$0xff]  ;;  %vm539_vm5 = vcmask 7168  }
  0x14   :  { %225 = vmatpush.msra.mxu3 %v158_v6  ;;  %v122_v9 = vld [vmem:[#allocation3 + $0xd8] sm:$0xff]  ;;  %166 = vmatpush.msra.mxu0 %v123_v3  ;;  %v156_v10 = vld [vmem:[#allocation3 + $0x1e8] sm:$0xff]  ;;  %v153_v11 = vld [vmem:[#allocation3 + $0x1d0] sm:$0xff] }
  0x15   :  { %206 = vmatpush.msra.mxu2 %v124_v5  ;;  %186 = vmatpush.msra.mxu1 %v155_v8  ;;  %v119_v12 = vld [vmem:[#allocation3 + $0xc0] sm:$0xff]  ;;  %v120_v13 = vld [vmem:[#allocation3 + $0xc8] sm:$0xff]  ;;  %v154_v14 = vld [vmem:[#allocation3 + $0x1d8] sm:$0xff] }
  0x16   :  { %226 = vmatpush.msra.mxu3 %v156_v10  ;;  %167 = vmatpush.msra.mxu0 %v121_v7  ;;  %v151_v15 = vld [vmem:[#allocation3 + $0x1c0] sm:$0xff]  ;;  %v152_v16 = vld [vmem:[#allocation3 + $0x1c8] sm:$0xff]  ;;  %v117_v17 = vld [vmem:[#allocation3 + $0xb0] sm:$0xff] }
  0x17   :  { %207 = vmatpush.msra.mxu2 %v122_v9  ;;  %187 = vmatpush.msra.mxu1 %v153_v11  ;;  %v118_v18 = vld [vmem:[#allocation3 + $0xb8] sm:$0xff]  ;;  %v149_v19 = vld [vmem:[#allocation3 + $0x1b0] sm:$0xff]  ;;  %v115_v21 = vld [vmem:[#allocation3 + $0xa0] sm:$0xff] }
  0x18   :  { %227 = vmatpush.msra.mxu3 %v154_v14  ;;  %168 = vmatpush.msra.mxu0 %v119_v12  ;;  %v150_v20 = vld [vmem:[#allocation3 + $0x1b8] sm:$0xff]  ;;  %v116_v22 = vld [vmem:[#allocation3 + $0xa8] sm:$0xff]  ;;  %v147_v23 = vld [vmem:[#allocation3 + $0x1a0] sm:$0xff] }
  0x19   :  { %208 = vmatpush.msra.mxu2 %v120_v13  ;;  %188 = vmatpush.msra.mxu1 %v151_v15  ;;  %v148_v24 = vld [vmem:[#allocation3 + $0x1a8] sm:$0xff]  ;;  %v113_v25 = vld [vmem:[#allocation3 + $0x90] sm:$0xff]  ;;  %v114_v26 = vld [vmem:[#allocation3 + $0x98] sm:$0xff] }
  0x1a   :  { %228 = vmatpush.msra.mxu3 %v152_v16  ;;  %169 = vmatpush.msra.mxu0 %v117_v17  ;;  %v145_v27 = vld [vmem:[#allocation3 + $0x190] sm:$0xff]  ;;  %v146_v28 = vld [vmem:[#allocation3 + $0x198] sm:$0xff]  ;;  %v111_v29 = vld [vmem:[#allocation3 + $0x80] sm:$0xff] }
  0x1b   :  { %209 = vmatpush.msra.mxu2 %v118_v18  ;;  %189 = vmatpush.msra.mxu1 %v149_v19  ;;  %v112_v30 = vld [vmem:[#allocation3 + $0x88] sm:$0xff]  ;;  %v143_v31 = vld [vmem:[#allocation3 + $0x180] sm:$0xff]  ;;  %v109_v33 = vld [vmem:[#allocation3 + $0x70] sm:$0xff] }
  0x1c   :  { %229 = vmatpush.msra.mxu3 %v150_v20  ;;  %170 = vmatpush.msra.mxu0 %v115_v21  ;;  %v144_v32 = vld [vmem:[#allocation3 + $0x188] sm:$0xff]  ;;  %v110_v34 = vld [vmem:[#allocation3 + $0x78] sm:$0xff]  ;;  %v141_v35 = vld [vmem:[#allocation3 + $0x170] sm:$0xff] }
  0x1d   :  { %210 = vmatpush.msra.mxu2 %v116_v22  ;;  %190 = vmatpush.msra.mxu1 %v147_v23  ;;  %v142_v36 = vld [vmem:[#allocation3 + $0x178] sm:$0xff]  ;;  %v107_v37 = vld [vmem:[#allocation3 + $0x60] sm:$0xff]  ;;  %v108_v38 = vld [vmem:[#allocation3 + $0x68] sm:$0xff] }
  0x1e   :  { %230 = vmatpush.msra.mxu3 %v148_v24  ;;  %171 = vmatpush.msra.mxu0 %v113_v25  ;;  %v139_v39 = vld [vmem:[#allocation3 + $0x160] sm:$0xff]  ;;  %v140_v40 = vld [vmem:[#allocation3 + $0x168] sm:$0xff]  ;;  %v105_v41 = vld [vmem:[#allocation3 + $0x50] sm:$0xff] }
  0x1f   :  { %211 = vmatpush.msra.mxu2 %v114_v26  ;;  %191 = vmatpush.msra.mxu1 %v145_v27  ;;  %v106_v42 = vld [vmem:[#allocation3 + $0x58] sm:$0xff]  ;;  %v137_v43 = vld [vmem:[#allocation3 + $0x150] sm:$0xff]  ;;  %v103_v45 = vld [vmem:[#allocation3 + $0x40] sm:$0xff] }
  0x20   :  { %231 = vmatpush.msra.mxu3 %v146_v28  ;;  %172 = vmatpush.msra.mxu0 %v111_v29  ;;  %v138_v44 = vld [vmem:[#allocation3 + $0x158] sm:$0xff]  ;;  %v104_v46 = vld [vmem:[#allocation3 + $0x48] sm:$0xff]  ;;  %v135_v47 = vld [vmem:[#allocation3 + $0x140] sm:$0xff] }
  0x21   :  { %212 = vmatpush.msra.mxu2 %v112_v30  ;;  %192 = vmatpush.msra.mxu1 %v143_v31  ;;  %v136_v48 = vld [vmem:[#allocation3 + $0x148] sm:$0xff]  ;;  %v101_v49 = vld [vmem:[#allocation3 + $0x30] sm:$0xff]  ;;  %v102_v50 = vld [vmem:[#allocation3 + $0x38] sm:$0xff] }
  0x22   :  { %232 = vmatpush.msra.mxu3 %v144_v32  ;;  %173 = vmatpush.msra.mxu0 %v109_v33  ;;  %v133_v51 = vld [vmem:[#allocation3 + $0x130] sm:$0xff]  ;;  %v134_v52 = vld [vmem:[#allocation3 + $0x138] sm:$0xff]  ;;  %v99_v53 = vld [vmem:[#allocation3 + $0x20] sm:$0xff] }
  0x23   :  { %213 = vmatpush.msra.mxu2 %v110_v34  ;;  %193 = vmatpush.msra.mxu1 %v141_v35  ;;  %v100_v54 = vld [vmem:[#allocation3 + $0x28] sm:$0xff]  ;;  %v131_v55 = vld [vmem:[#allocation3 + $0x120] sm:$0xff]  ;;  %v97_v57 = vld [vmem:[#allocation3 + $0x10] sm:$0xff] }
  0x24   :  { %233 = vmatpush.msra.mxu3 %v142_v36  ;;  %174 = vmatpush.msra.mxu0 %v107_v37  ;;  %v132_v56 = vld [vmem:[#allocation3 + $0x128] sm:$0xff]  ;;  %v98_v58 = vld [vmem:[#allocation3 + $0x18] sm:$0xff]  ;;  %v129_v59 = vld [vmem:[#allocation3 + $0x110] sm:$0xff] }
  0x25   :  { %214 = vmatpush.msra.mxu2 %v108_v38  ;;  %194 = vmatpush.msra.mxu1 %v139_v39  ;;  %v130_v60 = vld [vmem:[#allocation3 + $0x118] sm:$0xff]  ;;  %v95_v61 = vld [vmem:[#allocation3] sm:$0xff]  ;;  %v96_v62 = vld [vmem:[#allocation3 + $0x8] sm:$0xff] }
  0x26   :  { %234 = vmatpush.msra.mxu3 %v140_v40  ;;  %175 = vmatpush.msra.mxu0 %v105_v41  ;;  %v93_v63 = vld [vmem:[%s778_s0] sm:$0xff]  ;;  %v128_v1 = vld [vmem:[#allocation3 + $0x108] sm:$0xff]  ;;  %v277_v3 = vld [vmem:[#allocation5 + $0xf0] sm:$0xff] }
  0x27   :  { %215 = vmatpush.msra.mxu2 %v106_v42  ;;  %195 = vmatpush.msra.mxu1 %v137_v43  ;;  %v127_v0 = vld [vmem:[#allocation3 + $0x100] sm:$0xff]  ;;  %v278_v4 = vld [vmem:[#allocation5 + $0xf8] sm:$0xff]  ;;  %v296_v5 = vld [vmem:[#allocation5 + $0x188] sm:$0xf] }
  0x28   :  { %235 = vmatpush.msra.mxu3 %v138_v44  ;;  %176 = vmatpush.msra.mxu0 %v103_v45  ;;  %v94_v2 = vld [vmem:[%s778_s0 + $0x8] sm:$0xff]  ;;  %v294_v8 = vld [vmem:[#allocation5 + $0x178] sm:$0xff]  ;;  %v273_v9 = vld [vmem:[#allocation5 + $0xd0] sm:$0xff] }
  0x29   :  { %216 = vmatpush.msra.mxu2 %v104_v46  ;;  %196 = vmatpush.msra.mxu1 %v135_v47  ;;  %v275_v6 = vld [vmem:[#allocation5 + $0xe0] sm:$0xff]  ;;  %v276_v7 = vld [vmem:[#allocation5 + $0xe8] sm:$0xff]  ;;  %v274_v10 = vld [vmem:[#allocation5 + $0xd8] sm:$0xff] }
  0x2a   :  { %236 = vmatpush.msra.mxu3 %v136_v48  ;;  %177 = vmatpush.msra.mxu0 %v101_v49  ;;  %v271_v11 = vld [vmem:[#allocation5 + $0xc0] sm:$0xff]  ;;  %v272_v12 = vld [vmem:[#allocation5 + $0xc8] sm:$0xff]  ;;  %v269_v13 = vld [vmem:[#allocation5 + $0xb0] sm:$0xff] }
  0x2b   :  { %217 = vmatpush.msra.mxu2 %v102_v50  ;;  %197 = vmatpush.msra.mxu1 %v133_v51  ;;  %v270_v14 = vld [vmem:[#allocation5 + $0xb8] sm:$0xff]  ;;  %v267_v15 = vld [vmem:[#allocation5 + $0xa0] sm:$0xff]  ;;  %v268_v16 = vld [vmem:[#allocation5 + $0xa8] sm:$0xff] }
  0x2c   :  { %237 = vmatpush.msra.mxu3 %v134_v52  ;;  %178 = vmatpush.msra.mxu0 %v99_v53  ;;  %v265_v17 = vld [vmem:[#allocation5 + $0x90] sm:$0xff]  ;;  %v266_v18 = vld [vmem:[#allocation5 + $0x98] sm:$0xff]  ;;  %v263_v19 = vld [vmem:[#allocation5 + $0x80] sm:$0xff] }
  0x2d   :  { %218 = vmatpush.msra.mxu2 %v100_v54  ;;  %198 = vmatpush.msra.mxu1 %v131_v55  ;;  %v264_v20 = vld [vmem:[#allocation5 + $0x88] sm:$0xff]  ;;  %v261_v21 = vld [vmem:[#allocation5 + $0x70] sm:$0xff]  ;;  %v262_v22 = vld [vmem:[#allocation5 + $0x78] sm:$0xff] }
  0x2e   :  { %238 = vmatpush.msra.mxu3 %v132_v56  ;;  %179 = vmatpush.msra.mxu0 %v97_v57  ;;  %v259_v23 = vld [vmem:[#allocation5 + $0x60] sm:$0xff]  ;;  %v260_v24 = vld [vmem:[#allocation5 + $0x68] sm:$0xff]  ;;  %v257_v25 = vld [vmem:[#allocation5 + $0x50] sm:$0xff] }
  0x2f   :  { %219 = vmatpush.msra.mxu2 %v98_v58  ;;  %199 = vmatpush.msra.mxu1 %v129_v59  ;;  %v255_v26 = vld [vmem:[#allocation5 + $0x40] sm:$0xff]  ;;  %v253_v27 = vld [vmem:[#allocation5 + $0x30] sm:$0xff]  ;;  %v258_v33 = vld [vmem:[#allocation5 + $0x58] sm:$0xff] }
  0x30   :  { %239 = vmatpush.msra.mxu3 %v130_v60  ;;  %180 = vmatpush.msra.mxu0 %v95_v61  ;;  %v251_v28 = vld [vmem:[#allocation5 + $0x20] sm:$0xff]  ;;  %v249_v29 = vld [vmem:[#allocation5 + $0x10] sm:$0xff]  ;;  %v292_v34 = vld [vmem:[#allocation5 + $0x168] sm:$0xff] }
  0x31   :  { %220 = vmatpush.msra.mxu2 %v96_v62  ;;  %181 = vmatmul.f32.vlgmr.msra.gmra.mxu0 %v93_v63  ;;  %v247_v30 = vld [vmem:[#allocation5] sm:$0xff]  ;;  %v293_v32 = vld [vmem:[#allocation5 + $0x170] sm:$0xff]  ;;  %v256_v36 = vld [vmem:[#allocation5 + $0x48] sm:$0xff] }
  0x32   :  { %221 = vmatmul.f32.vlgmr.msra.gmra.mxu2 %v93_v63  ;;  %200 = vmatpush.msra.mxu1 %v127_v0  ;;  %v295_v31 = vld [vmem:[#allocation5 + $0x180] sm:$0xf]  ;;  %v290_v37 = vld [vmem:[#allocation5 + $0x158] sm:$0xff]  ;;  %v289_v38 = vld [vmem:[#allocation5 + $0x150] sm:$0xff] }
  0x33   :  { %240 = vmatpush.msra.mxu3 %v128_v1  ;;  %201 = vmatmul.f32.vlgmr.msra.gmra.mxu1 %v94_v2  ;;  %v291_v35 = vld [vmem:[#allocation5 + $0x160] sm:$0xff]  ;;  %v254_v39 = vld [vmem:[#allocation5 + $0x38] sm:$0xff]  ;;  %v288_v40 = vld [vmem:[#allocation5 + $0x148] sm:$0xff] }
  0x34   :  { %241 = vmatmul.f32.vlgmr.msra.gmra.mxu3 %v94_v2  ;;  %314 = vmatpush.msrb.mxu0 %v277_v3  ;;  %v397_v41 = vld [vmem:[%s784_s6] sm:$0xf]  ;;  %v252_v43 = vld [vmem:[#allocation5 + $0x28] sm:$0xff]  ;;  %v285_v45 = vld [vmem:[#allocation5 + $0x130] sm:$0xff] }
  0x35   :  { %354 = vmatpush.msrb.mxu2 %v278_v4  ;;  %549 = vmatpush.msk.msrb.mxu3 %vm307_vm0, %v296_v5  ;;  %v287_v42 = vld [vmem:[#allocation5 + $0x140] sm:$0xff]  ;;  %v286_v44 = vld [vmem:[#allocation5 + $0x138] sm:$0xff]  ;;  %v284_v47 = vld [vmem:[#allocation5 + $0x128] sm:$0xff] }
  0x36   :  { %315 = vmatpush.msrb.mxu0 %v275_v6  ;;  %551 = vmatpush.msk.msrb.mxu1 %vm307_vm0, %v397_v41  ;;  %v250_v46 = vld [vmem:[#allocation5 + $0x18] sm:$0xff]  ;;  %v283_v49 = vld [vmem:[#allocation5 + $0x120] sm:$0xff]  ;;  %v248_v50 = vld [vmem:[#allocation5 + $0x8] sm:$0xff] }
  0x37   :  { %355 = vmatpush.msrb.mxu2 %v276_v7  ;;  %382 = vmatpush.msrb.mxu3 %v294_v8  ;;  %v396_v48 = vld [vmem:[%s779_s1] sm:$0xff]  ;;  %v281_v52 = vld [vmem:[#allocation5 + $0x110] sm:$0xff]  ;;  %v280_v53 = vld [vmem:[#allocation5 + $0x108] sm:$0xff] }
  0x38   :  { %316 = vmatpush.msrb.mxu0 %v273_v9  ;;  %v282_v51 = vld [vmem:[#allocation5 + $0x118] sm:$0xff]  ;;  %v279_v54 = vld [vmem:[#allocation5 + $0x100] sm:$0xff]  ;;  %v445_v55 = vld [vmem:[#allocation7 + $0x78] sm:$0xff] }
  0x39   :  { %356 = vmatpush.msrb.mxu2 %v274_v10  ;;  %383 = vmatpush.msrb.mxu3 %v292_v34  ;;  %v444_v56 = vld [vmem:[#allocation7 + $0x70] sm:$0xff]  ;;  %v443_v57 = vld [vmem:[#allocation7 + $0x68] sm:$0xff]  ;;  %v442_v58 = vld [vmem:[#allocation7 + $0x60] sm:$0xff] }
  0x3a   :  { %317 = vmatpush.msrb.mxu0 %v271_v11  ;;  %480 = vmatpush.msra.mxu1 %v445_v55  ;;  %v441_v59 = vld [vmem:[#allocation7 + $0x58] sm:$0xff]  ;;  %v440_v60 = vld [vmem:[#allocation7 + $0x50] sm:$0xff]  ;;  %v439_v61 = vld [vmem:[#allocation7 + $0x48] sm:$0xff] }
  0x3b   :  { %357 = vmatpush.msrb.mxu2 %v272_v12  ;;  %384 = vmatpush.msrb.mxu3 %v290_v37  ;;  %v159_v62 = vld [vmem:[%s781_s3] sm:$0x3]  ;;  %v438_v63 = vld [vmem:[#allocation7 + $0x40] sm:$0xff]  ;;  %v437_v1 = vld [vmem:[#allocation7 + $0x38] sm:$0xff] }
  0x3c   :  { %318 = vmatpush.msrb.mxu0 %v269_v13  ;;  %552 = vmatmul.msk.f32.vlgmr.msrb.gmra.mxu1 %vm402_vm1, %v396_v48  ;;  %v161_v0 = vperm.slane %v159_v62, 0  ;;  %v162_v6 = vperm.slane %v159_v62, 1  ;;  %v451_v13 = vld [vmem:[%s787_s9 + $0x18] sm:$0xff] }
  0x3d   :  { %358 = vmatpush.msrb.mxu2 %v270_v14  ;;  %385 = vmatpush.msrb.mxu3 %v288_v40  ;;  %v436_v14 = vld [vmem:[#allocation7 + $0x30] sm:$0xff] }
  0x3e   :  { %319 = vmatpush.msrb.mxu0 %v267_v15  ;;  %481 = vmatpush.msra.mxu1 %v444_v56  ;;  %v562_v15 = vld [vmem:[%s785_s7] ss:$0 sm:$0xff] }
  0x3f   :  { %359 = vmatpush.msrb.mxu2 %v268_v16  ;;  %386 = vmatpush.msrb.mxu3 %v286_v44  ;;  %v450_v16 = vld [vmem:[%s787_s9 + $0x10] sm:$0xff] }
  0x40   :  { %320 = vmatpush.msrb.mxu0 %v265_v17  ;;  %482 = vmatpush.msra.mxu1 %v443_v57  ;;  %v435_v17 = vld [vmem:[#allocation7 + $0x28] sm:$0xff] }
  0x41   :  { %360 = vmatpush.msrb.mxu2 %v266_v18  ;;  %387 = vmatpush.msrb.mxu3 %v284_v47  ;;  %v449_v18 = vld [vmem:[%s787_s9 + $0x8] sm:$0xff] }
  0x42   :  { %321 = vmatpush.msrb.mxu0 %v263_v19  ;;  %483 = vmatpush.msra.mxu1 %v442_v58  ;;  %v434_v19 = vld [vmem:[#allocation7 + $0x20] sm:$0xff] }
  0x43   :  { %361 = vmatpush.msrb.mxu2 %v264_v20  ;;  %388 = vmatpush.msrb.mxu3 %v282_v51 }
  0x44   :  { %322 = vmatpush.msrb.mxu0 %v261_v21  ;;  %484 = vmatpush.msra.mxu1 %v441_v59  ;;  %v448_v21 = vld [vmem:[%s787_s9] sm:$0xff] }
  0x45   :  { %362 = vmatpush.msrb.mxu2 %v262_v22  ;;  %389 = vmatpush.msrb.mxu3 %v280_v53  ;;  %v433_v22 = vld [vmem:[#allocation7 + $0x18] sm:$0xff] }
  0x46   :  { %323 = vmatpush.msrb.mxu0 %v259_v23  ;;  %485 = vmatpush.msra.mxu1 %v440_v60 }
  0x47   :  { %363 = vmatpush.msrb.mxu2 %v260_v24  ;;  %468 = vmatpush.msra.mxu3 %v451_v13 }
  0x48   :  { %324 = vmatpush.msrb.mxu0 %v257_v25  ;;  %486 = vmatpush.msra.mxu1 %v439_v61  ;;  %v432_v25 = vld [vmem:[#allocation7 + $0x10] sm:$0xff] }
  0x49   :  { %364 = vmatpush.msrb.mxu2 %v258_v33  ;;  %469 = vmatpush.msra.mxu3 %v450_v16 }
  0x4a   :  { %325 = vmatpush.msrb.mxu0 %v255_v26  ;;  %487 = vmatpush.msra.mxu1 %v438_v63  ;;  %v431_v26 = vld [vmem:[#allocation7 + $0x8] sm:$0xff] }
  0x4b   :  { %365 = vmatpush.msrb.mxu2 %v256_v36  ;;  %470 = vmatpush.msra.mxu3 %v449_v18 }
  0x4c   :  { %326 = vmatpush.msrb.mxu0 %v253_v27  ;;  %488 = vmatpush.msra.mxu1 %v437_v1  ;;  %v447_v27 = vld [vmem:[#allocation7 + $0x88] sm:$0xff] }
  0x4d   :  { %366 = vmatpush.msrb.mxu2 %v254_v39  ;;  %471 = vmatpush.msra.mxu3 %v448_v21 }
  0x4e   :  { %327 = vmatpush.msrb.mxu0 %v251_v28  ;;  %489 = vmatpush.msra.mxu1 %v436_v14  ;;  %v430_v28 = vld [vmem:[#allocation7] sm:$0xff] }
  0x4f   :  { %367 = vmatpush.msrb.mxu2 %v252_v43 }
  0x50   :  { %328 = vmatpush.msrb.mxu0 %v249_v29  ;;  %490 = vmatpush.msra.mxu1 %v435_v17  ;;  %v446_v29 = vld [vmem:[#allocation7 + $0x80] sm:$0xff] }
  0x51   :  { %368 = vmatpush.msrb.mxu2 %v250_v46  ;;  %v563_v46 = vld [vmem:[%s788_s10] ss:$0 sm:$0xff] }
  0x52   :  { %329 = vmatpush.msrb.mxu0 %v247_v30  ;;  %491 = vmatpush.msra.mxu1 %v434_v19  ;;  %v297_v30 = vld [vmem:[%s783_s5] sm:$0x3] }
  0x53   :  { %369 = vmatpush.msrb.mxu2 %v248_v50  ;;  %v300_v33 = vperm.slane %v297_v30, 1  ;;  %v564_v50 = vld [vmem:[%s789_s11] ss:$0 sm:$0xff] }
  0x54   :  { %547 = vmatpush.msk.msra.mxu0 %vm307_vm0, %v295_v31  ;;  %492 = vmatpush.msra.mxu1 %v433_v22 }
  0x56   :  { %342 = vmatpush.msra.mxu0 %v293_v32  ;;  %493 = vmatpush.msra.mxu1 %v432_v25  ;;  %v299_v32 = vperm.slane %v297_v30, 0 }
  0x58   :  { %343 = vmatpush.msra.mxu0 %v291_v35  ;;  %494 = vmatpush.msra.mxu1 %v431_v26 }
  0x5a   :  { %344 = vmatpush.msra.mxu0 %v289_v38  ;;  %495 = vmatpush.msra.mxu1 %v430_v28 }
  0x5c   :  { %345 = vmatpush.msra.mxu0 %v287_v42 }
  0x5e   :  { %346 = vmatpush.msra.mxu0 %v285_v45 }
  0x60   :  { %347 = vmatpush.msra.mxu0 %v283_v49 }
  0x62   :  { %348 = vmatpush.msra.mxu0 %v281_v52 }
  0x64   :  { %349 = vmatpush.msra.mxu0 %v279_v54  ;;  %v565_v54 = vld [vmem:[#allocation2] ss:$0 sm:$0xff] }
  0xae   :  { %v182_v2 = vpop.f32.mrf.mxu0 }
  0xaf   :  { %v183_v3 = vadd.f32 %v182_v2, %v161_v0 }
  0xb0   :  { %v202_v4 = vpop.f32.mrf.mxu1 }
  0xb1   :  { %v203_v5 = vadd.f32 %v202_v4, %v183_v3 }
  0xb3   :  { %v245_v7 = vmax.f32 %v203_v5, 0.0 }
  0xb5   :  { %v222_v8 = vpop.f32.mrf.mxu2  ;;  %330 = vmatmul.f32.vlgmr.msrb.gmra.mxu0 %v245_v7  ;;  %370 = vmatmul.f32.vlgmr.msrb.gmra.mxu2 %v245_v7 }
  0xb6   :  { %v223_v9 = vadd.f32 %v222_v8, %v162_v6 }
  0xb7   :  { %v242_v10 = vpop.f32.mrf.mxu3 }
  0xb8   :  { %v243_v11 = vadd.f32 %v242_v10, %v223_v9 }
  0xb9   :  { %v426_v20 = vpop.f32.mrf.mxu1 }
  0xba   :  { %v246_v12 = vmax.f32 %v243_v11, 0.0  ;;  %v427_v23 = vadd.f32 %v562_v15, %v426_v20 }
  0xbc   :  { %550 = vmatmul.msk.f32.vlgmr.msrb.gmra.mxu3 %vm303_vm2, %v246_v12  ;;  %v429_v24 = vmax.f32 %v427_v23, 0.0 }
  0xbd   :  { %548 = vmatmul.msk.f32.vlgmr.msra.gmra.mxu0 %vm303_vm2, %v246_v12  ;;  %514 = vmatpush.msrb.mxu3 %v447_v27 }
  0xbf   :  { %515 = vmatpush.msrb.mxu3 %v446_v29 }
  0xc4   :  { %553 = vmatmul.msk.f32.vlgmr.msra.gmra.mxu3 %vm452_vm3, %v429_v24 }
 0x132   :  { %v331_v31 = vpop.f32.mrf.mxu0 }
 0x133   :  { %v332_v35 = vadd.f32 %v331_v31, %v299_v32 }
 0x138   :  { %v371_v34 = vpop.f32.mrf.mxu2 }
 0x139   :  { %v372_v38 = vadd.f32 %v371_v34, %v300_v33 }
 0x13a   :  { %v351_v36 = vpop.f32.mrf.mxu0 }
 0x13b   :  { %v352_v37 = vadd.f32 %v351_v36, %v332_v35 }
 0x13d   :  { %v394_v39 = vmax.f32 %v352_v37, 0.0 }
 0x13f   :  { %v391_v40 = vpop.f32.mrf.mxu3  ;;  %496 = vmatmul.f32.vlgmr.msra.gmra.mxu1 %v394_v39 }
 0x140   :  { %v392_v41 = vadd.f32 %v391_v40, %v372_v38 }
 0x142   :  { %v395_v42 = vmax.f32 %v392_v41, 0.0 }
 0x144   :  { %554 = vmatmul.msk.f32.vlgmr.msrb.gmra.mxu3 %vm476_vm4, %v395_v42 }
 0x147   :  { %v473_v43 = vpop.f32.mrf.mxu3 }
 0x1bc   :  { %v497_v44 = vpop.f32.mrf.mxu1 }
 0x1bd   :  { %v498_v45 = vadd.f32 %v497_v44, %v473_v43 }
 0x1c7   :  { %v517_v47 = vpop.f32.mrf.mxu3 }
 0x1c8   :  { %v518_v48 = vadd.f32 %v517_v47, %v498_v45 }
 0x1ca   :  { %v524_v49 = vadd.f32 %v563_v46, %v518_v48 }
 0x1cc   :  { %v525_v51 = vmax.f32 %v524_v49, 0.0 }
 0x1ce   :  { %v530_v52 = vmul.f32 %v564_v50, %v525_v51 }
 0x1d0   :  { %v531_v53 = vsel %vm452_vm3, %v530_v52, 0.0 }
 0x1d1   :  { %532 = vadd.xlane.f32.xlu0 %v531_v53 }
 0x244   :  { %v533_v55 = vpop.xlane.xlu0 %532 }
 0x245   :  { %v538_v56 = vadd.f32 %v565_v54, %v533_v55 }
 0x247   :  { %540 = vst.msk [vmem:[%s791_s13] sm:$0xff] %vm539_vm5, %v538_v56 }
 0x248   :  { %545 = vsyncpa [#allocation4], 1 }
 0x249   :  { %546 = vsyncpa [#allocation6], 1 }

</bundles_post_ra>
